<compile_context>
chip_gen: v7x
topology: tpu7x:2x2x1
jax: 0.10.0
libtpu: 0.0.40
codegen_flags: <defaults>
</compile_context>

<pallas_src>
import math

import jax
import jax.numpy as jnp
from jax.experimental import pallas as pl
from jax.experimental.pallas import tpu as pltpu


# ----------------------------------------------------------------------------
# Pallas kernel: elementwise pass-through (the "hot path" of the demo child).
# ----------------------------------------------------------------------------
_LANES = 128
_MAX_COLS = 4096
_TARGET_BLOCK_BYTES = 2 << 20    # ~2 MiB blocks: amortize per-step overhead,
_VMEM_LIMIT_BYTES = 32 << 20     # fits easily in 32 MiB scoped VMEM (v5e/v6e/v7x)


def _sublane_pack(dtype) -> int:
    """Packed sublane count per vreg: 8 for 4-byte, 16 for 2-byte, 32 for 1-byte."""
    itemsize = jnp.dtype(dtype).itemsize
    return max(8, 32 // max(itemsize, 1))


def _identity_kernel(x_ref, o_ref):
    o_ref[...] = x_ref[...]


def _choose_cols(total: int, pack: int) -> int:
    """Lane-dense width (multiple of 128, <= 4096); prefer widths needing no pad."""
    candidates = (_MAX_COLS, 2048, 1024, 512, 256, _LANES)
    # Prefer a width that also makes rows a multiple of the sublane packing.
    for c in candidates:
        if total % (c * pack) == 0:
            return c
    # Otherwise any width with no padding at all.
    for c in candidates:
        if total % c == 0:
            return c
    # Ragged element count: pad (at most 511 elements) to a 512-wide slab.
    return 512


def _pallas_identity_impl(x: jax.Array) -> jax.Array:
    orig_shape = x.shape
    total = math.prod(orig_shape)
    if total == 0:
        return x

    dtype = x.dtype
    itemsize = jnp.dtype(dtype).itemsize
    pack = _sublane_pack(dtype)

    cols = _choose_cols(total, pack)
    padded_total = pl.cdiv(total, cols) * cols
    rows = padded_total // cols

    flat = x.reshape(-1)
    if padded_total != total:
        # Only for ragged element counts; under jit this is a single small pad.
        flat = jnp.pad(flat, (0, padded_total - total))
    x2d = flat.reshape(rows, cols)

    # ~2 MiB blocks whose row count is a multiple of the dtype's sublane
    # packing (satisfies the (8,128) BlockSpec rule even for a ragged grid).
    max_tile_rows = max(pack, (_TARGET_BLOCK_BYTES // (cols * itemsize)) // pack * pack)
    tile_rows = rows if rows <= max_tile_rows else max_tile_rows
    num_blocks = pl.cdiv(rows, tile_rows)

    # v7x megacore: when there is enough work, make sure the parallel grid axis
    # actually has >= 2 (and preferably an even number of) steps. The cdiv grid
    # masks the ragged final block, so no exact-divisor search is needed.
    if rows > pack and (num_blocks == 1 or num_blocks % 2 == 1):
        target = 2 if num_blocks == 1 else num_blocks + 1
        tile_rows = max(pack, pl.cdiv(pl.cdiv(rows, target), pack) * pack)
        num_blocks = pl.cdiv(rows, tile_rows)

    out2d = pl.pallas_call(
        _identity_kernel,
        out_shape=jax.ShapeDtypeStruct((rows, cols), dtype),
        grid=(num_blocks,),
        in_specs=[pl.BlockSpec((tile_rows, cols), lambda i: (i, 0))],
        out_specs=pl.BlockSpec((tile_rows, cols), lambda i: (i, 0)),
        compiler_params=pltpu.CompilerParams(
            dimension_semantics=("parallel",),
            vmem_limit_bytes=_VMEM_LIMIT_BYTES,
        ),
        cost_estimate=pl.CostEstimate(
            flops=0,
            transcendentals=0,
            bytes_accessed=2 * padded_total * itemsize,
        ),
    )(x2d)

    out_flat = out2d.reshape(-1)
    if padded_total != total:
        out_flat = out_flat[:total]
    return out_flat.reshape(orig_shape)


# Single compiled program per input shape/dtype (removes eager dispatch cost).
pallas_identity = jax.jit(_pallas_identity_impl)


# ----------------------------------------------------------------------------
# BaseModel framework (OmegaConf replaced by plain-dict merging).
# ----------------------------------------------------------------------------
def _merge_confs(*confs):
    out = {}
    for c in confs:
        if c:
            out.update(dict(c))
    return out


class BaseModel:
    """JAX port of the abstract PyTorch BaseModel."""

    default_conf = {"name": None, "trainable": False}
    required_data = []

    def __init__(self, conf=None):
        # emulate MetaModel.__prepare__ : merge default_conf across bases
        base_default_conf = {}
        for base in reversed(type(self).__mro__):
            base_default_conf = _merge_confs(
                base_default_conf, getattr(base, "default_conf", {})
            )
        self.conf = _merge_confs(base_default_conf, conf or {})
        self._init(self.conf)
        # TODO(synk): `trainable=False` param-freezing (requires_grad) has no
        # Pallas/JAX-array equivalent here (BaseModel defines no parameters).

    def forward(self, data):
        """Check the data and call the _forward method of the child model."""

        def recursive_key_check(expected, given):
            for key in expected:
                assert key in given, f"Missing key {key} in data"
                if isinstance(expected, dict):
                    recursive_key_check(expected[key], given[key])

        recursive_key_check(self.required_data, data)
        return self._forward(data)

    __call__ = forward

    # abstract in the original; raise like the PyTorch version
    def _init(self, conf):
        raise NotImplementedError

    def _forward(self, data):
        raise NotImplementedError

    def loss(self, pred, data):
        raise NotImplementedError


class DemoModel(BaseModel):
    """Minimal concrete child: identity compute routed through Pallas."""

    default_conf = {"name": "demo"}
    required_data = ["x"]

    def _init(self, conf):
        # BaseModel / this demo define no parameters.
        pass

    def _forward(self, data):
        return {"out": pallas_identity(data["x"])}

    def loss(self, pred, data):
        # TODO(synk): loss is abstract in BaseModel; no defined semantics.
        raise NotImplementedError


# ----------------------------------------------------------------------------
if __name__ == "__main__":
    key = jax.random.PRNGKey(0)
    k0, k1, k2 = jax.random.split(key, 3)

    model = DemoModel({"trainable": False})

    # NCHW example input, shape (2, 4, 16, 16) -> lane-dense (8, 256) slab.
    x = jax.random.normal(k0, (2, 4, 16, 16), dtype=jnp.float32)
    pred = model({"x": x})
    out = jax.block_until_ready(pred["out"])
    assert out.shape == x.shape and out.dtype == x.dtype
    assert bool(jnp.allclose(out, x))

    # Ragged element count (not a multiple of 128) -> padded path.
    y = jax.random.normal(k1, (3, 5, 7), dtype=jnp.float32)
    out_y = jax.block_until_ready(model({"x": y})["out"])
    assert out_y.shape == y.shape and bool(jnp.allclose(out_y, y))

    # Slightly larger input -> exercises the >=2-block (megacore) grid path.
    z = jax.random.normal(k2, (64, 1024), dtype=jnp.float32)
    out_z = jax.block_until_ready(model({"x": z})["out"])
    assert out_z.shape == z.shape and bool(jnp.allclose(out_z, z))

    print("KERNEL_OK")
</pallas_src>

<mosaic_0001>
module attributes {stable_mosaic.version = 11 : i64} {
  func.func @_identity_kernel(%arg0: i32, %arg1: memref<8x256xf32, #tpu.memory_space<vmem>>, %arg2: memref<8x256xf32, #tpu.memory_space<vmem>>) attributes {dimension_semantics = [#tpu.dimension_semantics<parallel>], iteration_bounds = array<i64: 1>, scalar_prefetch = 0 : i64, scratch_operands = 0 : i64, tpu.core_type = #tpu.core_type<tc>, window_params = [{transform_indices = @transform_0, window_bounds = array<i64: 8, 256>}, {transform_indices = @transform_1, window_bounds = array<i64: 8, 256>}]} {
    %c0 = arith.constant 0 : index
    %c0_0 = arith.constant 0 : index
    %0 = vector.load %arg1[%c0, %c0_0] : memref<8x256xf32, #tpu.memory_space<vmem>>, vector<8x256xf32>
    %c0_1 = arith.constant 0 : index
    %c0_2 = arith.constant 0 : index
    %1 = vector.load %arg2[%c0_1, %c0_2] : memref<8x256xf32, #tpu.memory_space<vmem>>, vector<8x256xf32>
    tpu.vector_store %arg2[%c0_1, %c0_2], %0 {strides = array<i32>} : memref<8x256xf32, #tpu.memory_space<vmem>>, vector<8x256xf32>,
    return
  }
  func.func @transform_0(%arg0: i32) -> (i32, i32) {
    %c0_i32 = arith.constant 0 : i32
    %c0_i32_0 = arith.constant 0 : i32
    return %arg0, %c0_i32 : i32, i32
  }
  func.func @transform_1(%arg0: i32) -> (i32, i32) {
    %c0_i32 = arith.constant 0 : i32
    %c0_i32_0 = arith.constant 0 : i32
    return %arg0, %c0_i32 : i32, i32
  }
}

</mosaic_0001>

<bundles_post_ra>
// kernel: _pallas_identity_impl.1
= control target key start
LH: loop header
LB: loop body
LE: loop exit
PB: predicated region body
PF: predicated region fallthrough
CT: control target
= control target key end

     0   :  { %s38_s0 = inlined_call_operand.vmem [shape: f32[8,256], index: 0, kind: input, shape index: {}]   ;;  %s39_s1 = inlined_call_operand.vmem [shape: f32[8,256], index: 1, kind: output, shape index: {}]  }
   0x1   :  { %v8_v0 = vld [vmem:[%s38_s0] sm:$0xff]  ;;  %v9_v1 = vld [vmem:[%s38_s0 + $0x8] sm:$0xff] }
   0x2   :  { %10 = vst [vmem:[%s39_s1] sm:$0xff] %v8_v0  ;;  %11 = vst [vmem:[%s39_s1 + $0x8] sm:$0xff] %v9_v1 }

</bundles_post_ra>
